<compile_context>
chip_gen: v5e
topology: v5e:2x2
jax: 0.10.0
libtpu: 0.0.40
codegen_flags: <defaults>
</compile_context>

<pallas_src>
import math
import numpy as np
import jax
import jax.numpy as jnp
from jax import lax
from jax.experimental import pallas as pl
from jax.experimental.pallas import tpu as pltpu


# ----------------------------------------------------------------------------
# Schedule (identical to the PyTorch cosine_beta_schedule)
# ----------------------------------------------------------------------------
def cosine_beta_schedule(timesteps, s=0.008):
    steps = timesteps + 1
    x = np.linspace(0, steps, steps)
    alphas_cumprod = np.cos((x / steps + s) / (1 + s) * np.pi * 0.5) ** 2
    alphas_cumprod = alphas_cumprod / alphas_cumprod[0]
    betas = 1 - alphas_cumprod[1:] / alphas_cumprod[:-1]
    return np.clip(betas, a_min=0, a_max=0.999)


# ----------------------------------------------------------------------------
# Kernel factory: fused q_sample + 1x1x1-conv denoise_fn + |noise - recon|,
# accumulated into the resident output block across the spatial grid axis.
# ----------------------------------------------------------------------------
def _make_kernel(C, tile_r, n_inner, s_valid, needs_mask):
    def kernel(coefs_ref,   # SMEM (B, 2)  : [sqrt_ac, sqrt_1m_ac] per batch
               w_ref,       # SMEM (C, C)  : conv weight
               bt_ref,      # SMEM (B, C)  : conv bias + time embedding
               x_ref,       # VMEM (C, TILE_R, 128) f32
               n_ref,       # VMEM (C, TILE_R, 128) f32
               out_ref):    # VMEM (TILE_R, 128) f32 resident accumulator
        b = pl.program_id(0)
        so = pl.program_id(1)
        si = pl.program_id(2)

        @pl.when(si == 0)
        def _():
            out_ref[...] = jnp.zeros_like(out_ref)

        a = coefs_ref[b, 0]       # sqrt(alphas_cumprod[t_b])
        sig = coefs_ref[b, 1]     # sqrt(1 - alphas_cumprod[t_b])

        # q_sample per channel: each slab is a stack of full (8,128) vregs.
        xn = [a * x_ref[c] + sig * n_ref[c] for c in range(C)]

        # Channel mix as fully-unrolled scalar-broadcast FMAs (VPU only) and
        # per-position |noise - recon| accumulated over output channels.
        part = None
        for co in range(C):
            mix = w_ref[co, 0] * xn[0]
            for ci in range(1, C):
                mix = mix + w_ref[co, ci] * xn[ci]
            d = jnp.abs(n_ref[co] - (mix + bt_ref[b, co]))
            part = d if part is None else part + d

        if needs_mask:
            # Zero out padded spatial positions (only compiled in when the
            # flattened spatial size was padded up to a multiple of 128*TILE_R).
            rows = lax.broadcasted_iota(jnp.int32, (tile_r, 128), 0)
            lanes = lax.broadcasted_iota(jnp.int32, (tile_r, 128), 1)
            grow = (so * n_inner + si) * tile_r + rows
            flat = grow * 128 + lanes
            part = jnp.where(flat < s_valid, part, 0.0)

        out_ref[...] += part

    return kernel


def _choose_tile_r(R, C, max_block_bytes):
    """Largest sublane-tile (rows of 128 lanes) whose f32 input block
    (C, TILE_R, 128) stays under max_block_bytes; multiple of 8 when tiling."""
    bytes_per_row = C * 128 * 4
    max_r = max(8, max_block_bytes // bytes_per_row)
    if R <= max_r:
        return int(R)                # single tile == full extent (always legal)
    return int(max(8, (max_r // 8) * 8))


def _l1_loss_pallas(coefs, x, noise, w, bt, *, max_block_bytes=2 << 20):
    """coefs: (B,2) f32, x/noise: (B,C,D,H,W) f32, w: (C,C), bt: (B,C)."""
    B, C, D, H, W = x.shape
    S = D * H * W
    xf = x.reshape(B, C, S)
    nf = noise.reshape(B, C, S)

    R = pl.cdiv(S, 128)
    tile_r = _choose_tile_r(R, C, max_block_bytes)
    gs = pl.cdiv(R, tile_r)
    # Keep both v7x TensorCores busy when B == 1 by splitting spatial tiles
    # into an outer parallel axis.
    n_outer = 2 if (B == 1 and gs >= 2) else 1
    n_inner = pl.cdiv(gs, n_outer)
    gs = n_outer * n_inner
    Rp = gs * tile_r
    Sp = Rp * 128
    needs_mask = (Sp != S)
    if needs_mask:
        # TODO(synk): padding here costs one extra HBM pass for awkward D*H*W;
        # only hit when S is not a multiple of 128*TILE_R.
        pad = Sp - S
        xf = jnp.pad(xf, ((0, 0), (0, 0), (0, pad)))
        nf = jnp.pad(nf, ((0, 0), (0, 0), (0, pad)))
    xr = xf.reshape(B, C, Rp, 128)
    nr = nf.reshape(B, C, Rp, 128)

    kernel = _make_kernel(C, tile_r, n_inner, S, needs_mask)

    partials = pl.pallas_call(
        kernel,
        grid=(B, n_outer, n_inner),
        in_specs=[
            pl.BlockSpec(memory_space=pltpu.MemorySpace.SMEM),   # coefs (B,2)
            pl.BlockSpec(memory_space=pltpu.MemorySpace.SMEM),   # w     (C,C)
            pl.BlockSpec(memory_space=pltpu.MemorySpace.SMEM),   # bt    (B,C)
            pl.BlockSpec((None, C, tile_r, 128),
                         lambda b, so, si: (b, 0, so * n_inner + si, 0)),
            pl.BlockSpec((None, C, tile_r, 128),
                         lambda b, so, si: (b, 0, so * n_inner + si, 0)),
        ],
        out_specs=pl.BlockSpec((None, None, tile_r, 128),
                               lambda b, so, si: (b, so, 0, 0)),
        out_shape=jax.ShapeDtypeStruct((B, n_outer, tile_r, 128), jnp.float32),
        compiler_params=pltpu.CompilerParams(
            dimension_semantics=("parallel", "parallel", "arbitrary"),
            vmem_limit_bytes=32 * 1024 * 1024),
    )(coefs, w, bt, xr, nr)

    # Tiny cross-block / batch reduction + mean in JAX glue.
    return jnp.sum(partials) / (B * C * S)


# ----------------------------------------------------------------------------
# GaussianDiffusion (JAX / Pallas)
# ----------------------------------------------------------------------------
class GaussianDiffusion:
    def __init__(self, *, image_size, depth_size, channels=1, timesteps=1000,
                 loss_type='l1', temb_dim=32, param_key=None):
        self.channels = channels
        self.image_size = image_size
        self.depth_size = depth_size
        self.loss_type = loss_type
        self.temb_dim = temb_dim

        betas = cosine_beta_schedule(timesteps)
        alphas = 1.0 - betas
        alphas_cumprod = np.cumprod(alphas, axis=0)
        self.num_timesteps = int(betas.shape[0])

        self.sqrt_alphas_cumprod = jnp.asarray(
            np.sqrt(alphas_cumprod), dtype=jnp.float32)
        self.sqrt_one_minus_alphas_cumprod = jnp.asarray(
            np.sqrt(1.0 - alphas_cumprod), dtype=jnp.float32)

        # Deterministic synthetic denoise_fn parameters (1x1x1 conv + time MLP).
        if param_key is None:
            param_key = jax.random.PRNGKey(42)
        k1, k2, k3 = jax.random.split(param_key, 3)
        C = channels
        self.conv_w = (0.1 * jax.random.normal(k1, (C, C))).astype(jnp.float32)
        self.conv_b = (0.01 * jax.random.normal(k2, (C,))).astype(jnp.float32)
        self.temb_w = (0.1 * jax.random.normal(k3, (temb_dim, C))).astype(jnp.float32)

    # -- time embedding (tiny, stays in plain JAX glue) -----------------------
    def _time_embedding(self, t):
        half = self.temb_dim // 2
        freqs = jnp.exp(
            -math.log(10000.0) * jnp.arange(half, dtype=jnp.float32) / half)
        args = t.astype(jnp.float32)[:, None] * freqs[None, :]
        emb = jnp.concatenate([jnp.sin(args), jnp.cos(args)], axis=-1)  # (B, temb)
        return (emb @ self.temb_w).astype(jnp.float32)                  # (B, C)

    # -- p_losses with L1 loss (hot path in the Pallas kernel) ----------------
    def p_losses(self, x_start, t, noise, *, max_block_bytes=2 << 20):
        # extract(...) coefficients merged into one (B, 2) SMEM table.
        coefs = jnp.stack([self.sqrt_alphas_cumprod[t],
                           self.sqrt_one_minus_alphas_cumprod[t]],
                          axis=-1).astype(jnp.float32)
        # conv bias + time embedding folded into one (B, C) SMEM table.
        bt = (self.conv_b[None, :] + self._time_embedding(t)).astype(jnp.float32)

        if self.loss_type != 'l1':
            # TODO(synk): 'l2' loss branch and with_condition concat path not
            # wired into this synthetic kernel (module defaults: loss_type='l1',
            # with_condition=False).
            raise NotImplementedError()
        return _l1_loss_pallas(coefs, x_start, noise, self.conv_w, bt,
                               max_block_bytes=max_block_bytes)

    def __call__(self, x, rng):
        B, C, D, H, W = x.shape
        assert (H == self.image_size and W == self.image_size
                and D == self.depth_size)
        kt, kn = jax.random.split(rng)
        t = jax.random.randint(kt, (B,), 0, self.num_timesteps, dtype=jnp.int32)
        noise = jax.random.normal(kn, x.shape, dtype=jnp.float32)
        return self.p_losses(x, t, noise)


# ----------------------------------------------------------------------------
# Pure-JAX reference (same f32 math as the kernel / PyTorch module)
# ----------------------------------------------------------------------------
def reference_loss(model, x, t, noise):
    B, C = x.shape[0], x.shape[1]
    xf = x.reshape(B, C, -1)
    nf = noise.reshape(B, C, -1)
    a = model.sqrt_alphas_cumprod[t].reshape(B, 1, 1)
    s = model.sqrt_one_minus_alphas_cumprod[t].reshape(B, 1, 1)
    x_noisy = a * xf + s * nf
    recon = jnp.einsum('oc,bcs->bos', model.conv_w, x_noisy)
    bt = model.conv_b[None, :] + model._time_embedding(t)
    recon = recon + bt[:, :, None]
    return jnp.mean(jnp.abs(nf - recon))


if __name__ == "__main__":
    B, C, D, H, W = 2, 4, 16, 16, 16

    model = GaussianDiffusion(image_size=H, depth_size=D, channels=C,
                              timesteps=1000, loss_type='l1',
                              param_key=jax.random.PRNGKey(42))

    key = jax.random.PRNGKey(0)
    kx, kfwd = jax.random.split(key)
    x = jax.random.normal(kx, (B, C, D, H, W), dtype=jnp.float32)

    loss = model(x, kfwd)
    loss = jax.block_until_ready(loss)

    # Sanity check against a pure-JAX reference using identical t / noise.
    kt, kn = jax.random.split(kfwd)
    t = jax.random.randint(kt, (B,), 0, model.num_timesteps, dtype=jnp.int32)
    noise = jax.random.normal(kn, x.shape, dtype=jnp.float32)
    ref = jax.block_until_ready(reference_loss(model, x, t, noise))
    assert jnp.allclose(loss, ref, atol=1e-4, rtol=1e-4), (loss, ref)

    print("KERNEL_OK")
</pallas_src>

<mosaic_0001>
module attributes {stable_mosaic.version = 11 : i64} {
  func.func @kernel(%arg0: i32, %arg1: i32, %arg2: i32, %arg3: memref<2x2xf32, #tpu.memory_space<smem>>, %arg4: memref<4x4xf32, #tpu.memory_space<smem>>, %arg5: memref<2x4xf32, #tpu.memory_space<smem>>, %arg6: memref<1x4x32x128xf32, #tpu.memory_space<vmem>>, %arg7: memref<1x4x32x128xf32, #tpu.memory_space<vmem>>, %arg8: memref<1x1x32x128xf32, #tpu.memory_space<vmem>>) attributes {dimension_semantics = [#tpu.dimension_semantics<parallel>, #tpu.dimension_semantics<parallel>, #tpu.dimension_semantics<arbitrary>], iteration_bounds = array<i64: 2, 1, 1>, scalar_prefetch = 0 : i64, scratch_operands = 0 : i64, tpu.core_type = #tpu.core_type<tc>, window_params = [{transform_indices = @transform_0, window_bounds = array<i64: 2, 2>}, {transform_indices = @transform_1, window_bounds = array<i64: 4, 4>}, {transform_indices = @transform_2, window_bounds = array<i64: 2, 4>}, {transform_indices = @transform_3, window_bounds = array<i64: 1, 4, 32, 128>}, {transform_indices = @transform_4, window_bounds = array<i64: 1, 4, 32, 128>}, {transform_indices = @transform_5, window_bounds = array<i64: 1, 1, 32, 128>}]} {
    %c0_i32 = arith.constant 0 : i32
    %0 = arith.cmpi eq, %arg2, %c0_i32 : i32
    %1 = arith.extui %0 : i1 to i32
    %c0_i32_0 = arith.constant 0 : i32
    %2 = arith.cmpi ne, %1, %c0_i32_0 : i32
    scf.if %2 {
      %cst = arith.constant 0.000000e+00 : f32
      %144 = vector.broadcast %cst : f32 to vector<32x128xf32>
      %c0_91 = arith.constant 0 : index
      %c0_92 = arith.constant 0 : index
      %c0_93 = arith.constant 0 : index
      %c0_94 = arith.constant 0 : index
      %145 = vector.load %arg8[%c0_91, %c0_92, %c0_93, %c0_94] : memref<1x1x32x128xf32, #tpu.memory_space<vmem>>, vector<1x1x32x128xf32>
      %146 = vector.shape_cast %145 : vector<1x1x32x128xf32> to vector<32x128xf32>
      %147 = vector.shape_cast %144 : vector<32x128xf32> to vector<1x1x32x128xf32>
      tpu.vector_store %arg8[%c0_91, %c0_92, %c0_93, %c0_94], %147 {strides = array<i32>} : memref<1x1x32x128xf32, #tpu.memory_space<vmem>>, vector<1x1x32x128xf32>,
    } else {
    }
    %3 = arith.index_cast %arg0 : i32 to index
    %c0 = arith.constant 0 : index
    %4 = memref.load %arg3[%3, %c0] : memref<2x2xf32, #tpu.memory_space<smem>>
    %5 = arith.index_cast %arg0 : i32 to index
    %c1 = arith.constant 1 : index
    %6 = memref.load %arg3[%5, %c1] : memref<2x2xf32, #tpu.memory_space<smem>>
    %c0_1 = arith.constant 0 : index
    %c0_2 = arith.constant 0 : index
    %c0_3 = arith.constant 0 : index
    %c0_4 = arith.constant 0 : index
    %7 = vector.load %arg6[%c0_1, %c0_2, %c0_3, %c0_4] : memref<1x4x32x128xf32, #tpu.memory_space<vmem>>, vector<1x1x32x128xf32>
    %8 = vector.shape_cast %7 : vector<1x1x32x128xf32> to vector<32x128xf32>
    %9 = vector.broadcast %4 : f32 to vector<32x128xf32>
    %10 = arith.mulf %9, %8 : vector<32x128xf32>
    %c0_5 = arith.constant 0 : index
    %c0_6 = arith.constant 0 : index
    %c0_7 = arith.constant 0 : index
    %c0_8 = arith.constant 0 : index
    %11 = vector.load %arg7[%c0_5, %c0_6, %c0_7, %c0_8] : memref<1x4x32x128xf32, #tpu.memory_space<vmem>>, vector<1x1x32x128xf32>
    %12 = vector.shape_cast %11 : vector<1x1x32x128xf32> to vector<32x128xf32>
    %13 = vector.broadcast %6 : f32 to vector<32x128xf32>
    %14 = arith.mulf %13, %12 : vector<32x128xf32>
    %15 = arith.addf %10, %14 : vector<32x128xf32>
    %c0_9 = arith.constant 0 : index
    %c1_10 = arith.constant 1 : index
    %c0_11 = arith.constant 0 : index
    %c0_12 = arith.constant 0 : index
    %16 = vector.load %arg6[%c0_9, %c1_10, %c0_11, %c0_12] : memref<1x4x32x128xf32, #tpu.memory_space<vmem>>, vector<1x1x32x128xf32>
    %17 = vector.shape_cast %16 : vector<1x1x32x128xf32> to vector<32x128xf32>
    %18 = vector.broadcast %4 : f32 to vector<32x128xf32>
    %19 = arith.mulf %18, %17 : vector<32x128xf32>
    %c0_13 = arith.constant 0 : index
    %c1_14 = arith.constant 1 : index
    %c0_15 = arith.constant 0 : index
    %c0_16 = arith.constant 0 : index
    %20 = vector.load %arg7[%c0_13, %c1_14, %c0_15, %c0_16] : memref<1x4x32x128xf32, #tpu.memory_space<vmem>>, vector<1x1x32x128xf32>
    %21 = vector.shape_cast %20 : vector<1x1x32x128xf32> to vector<32x128xf32>
    %22 = vector.broadcast %6 : f32 to vector<32x128xf32>
    %23 = arith.mulf %22, %21 : vector<32x128xf32>
    %24 = arith.addf %19, %23 : vector<32x128xf32>
    %c0_17 = arith.constant 0 : index
    %c2 = arith.constant 2 : index
    %c0_18 = arith.constant 0 : index
    %c0_19 = arith.constant 0 : index
    %25 = vector.load %arg6[%c0_17, %c2, %c0_18, %c0_19] : memref<1x4x32x128xf32, #tpu.memory_space<vmem>>, vector<1x1x32x128xf32>
    %26 = vector.shape_cast %25 : vector<1x1x32x128xf32> to vector<32x128xf32>
    %27 = vector.broadcast %4 : f32 to vector<32x128xf32>
    %28 = arith.mulf %27, %26 : vector<32x128xf32>
    %c0_20 = arith.constant 0 : index
    %c2_21 = arith.constant 2 : index
    %c0_22 = arith.constant 0 : index
    %c0_23 = arith.constant 0 : index
    %29 = vector.load %arg7[%c0_20, %c2_21, %c0_22, %c0_23] : memref<1x4x32x128xf32, #tpu.memory_space<vmem>>, vector<1x1x32x128xf32>
    %30 = vector.shape_cast %29 : vector<1x1x32x128xf32> to vector<32x128xf32>
    %31 = vector.broadcast %6 : f32 to vector<32x128xf32>
    %32 = arith.mulf %31, %30 : vector<32x128xf32>
    %33 = arith.addf %28, %32 : vector<32x128xf32>
    %c0_24 = arith.constant 0 : index
    %c3 = arith.constant 3 : index
    %c0_25 = arith.constant 0 : index
    %c0_26 = arith.constant 0 : index
    %34 = vector.load %arg6[%c0_24, %c3, %c0_25, %c0_26] : memref<1x4x32x128xf32, #tpu.memory_space<vmem>>, vector<1x1x32x128xf32>
    %35 = vector.shape_cast %34 : vector<1x1x32x128xf32> to vector<32x128xf32>
    %36 = vector.broadcast %4 : f32 to vector<32x128xf32>
    %37 = arith.mulf %36, %35 : vector<32x128xf32>
    %c0_27 = arith.constant 0 : index
    %c3_28 = arith.constant 3 : index
    %c0_29 = arith.constant 0 : index
    %c0_30 = arith.constant 0 : index
    %38 = vector.load %arg7[%c0_27, %c3_28, %c0_29, %c0_30] : memref<1x4x32x128xf32, #tpu.memory_space<vmem>>, vector<1x1x32x128xf32>
    %39 = vector.shape_cast %38 : vector<1x1x32x128xf32> to vector<32x128xf32>
    %40 = vector.broadcast %6 : f32 to vector<32x128xf32>
    %41 = arith.mulf %40, %39 : vector<32x128xf32>
    %42 = arith.addf %37, %41 : vector<32x128xf32>
    %c0_31 = arith.constant 0 : index
    %c0_32 = arith.constant 0 : index
    %43 = memref.load %arg4[%c0_31, %c0_32] : memref<4x4xf32, #tpu.memory_space<smem>>
    %44 = vector.broadcast %43 : f32 to vector<32x128xf32>
    %45 = arith.mulf %44, %15 : vector<32x128xf32>
    %c0_33 = arith.constant 0 : index
    %c1_34 = arith.constant 1 : index
    %46 = memref.load %arg4[%c0_33, %c1_34] : memref<4x4xf32, #tpu.memory_space<smem>>
    %47 = vector.broadcast %46 : f32 to vector<32x128xf32>
    %48 = arith.mulf %47, %24 : vector<32x128xf32>
    %49 = arith.addf %45, %48 : vector<32x128xf32>
    %c0_35 = arith.constant 0 : index
    %c2_36 = arith.constant 2 : index
    %50 = memref.load %arg4[%c0_35, %c2_36] : memref<4x4xf32, #tpu.memory_space<smem>>
    %51 = vector.broadcast %50 : f32 to vector<32x128xf32>
    %52 = arith.mulf %51, %33 : vector<32x128xf32>
    %53 = arith.addf %49, %52 : vector<32x128xf32>
    %c0_37 = arith.constant 0 : index
    %c3_38 = arith.constant 3 : index
    %54 = memref.load %arg4[%c0_37, %c3_38] : memref<4x4xf32, #tpu.memory_space<smem>>
    %55 = vector.broadcast %54 : f32 to vector<32x128xf32>
    %56 = arith.mulf %55, %42 : vector<32x128xf32>
    %57 = arith.addf %53, %56 : vector<32x128xf32>
    %c0_39 = arith.constant 0 : index
    %c0_40 = arith.constant 0 : index
    %c0_41 = arith.constant 0 : index
    %c0_42 = arith.constant 0 : index
    %58 = vector.load %arg7[%c0_39, %c0_40, %c0_41, %c0_42] : memref<1x4x32x128xf32, #tpu.memory_space<vmem>>, vector<1x1x32x128xf32>
    %59 = vector.shape_cast %58 : vector<1x1x32x128xf32> to vector<32x128xf32>
    %60 = arith.index_cast %arg0 : i32 to index
    %c0_43 = arith.constant 0 : index
    %61 = memref.load %arg5[%60, %c0_43] : memref<2x4xf32, #tpu.memory_space<smem>>
    %62 = vector.broadcast %61 : f32 to vector<32x128xf32>
    %63 = arith.addf %57, %62 : vector<32x128xf32>
    %64 = arith.subf %59, %63 : vector<32x128xf32>
    %65 = math.absf %64 : vector<32x128xf32>
    %c1_44 = arith.constant 1 : index
    %c0_45 = arith.constant 0 : index
    %66 = memref.load %arg4[%c1_44, %c0_45] : memref<4x4xf32, #tpu.memory_space<smem>>
    %67 = vector.broadcast %66 : f32 to vector<32x128xf32>
    %68 = arith.mulf %67, %15 : vector<32x128xf32>
    %c1_46 = arith.constant 1 : index
    %c1_47 = arith.constant 1 : index
    %69 = memref.load %arg4[%c1_46, %c1_47] : memref<4x4xf32, #tpu.memory_space<smem>>
    %70 = vector.broadcast %69 : f32 to vector<32x128xf32>
    %71 = arith.mulf %70, %24 : vector<32x128xf32>
    %72 = arith.addf %68, %71 : vector<32x128xf32>
    %c1_48 = arith.constant 1 : index
    %c2_49 = arith.constant 2 : index
    %73 = memref.load %arg4[%c1_48, %c2_49] : memref<4x4xf32, #tpu.memory_space<smem>>
    %74 = vector.broadcast %73 : f32 to vector<32x128xf32>
    %75 = arith.mulf %74, %33 : vector<32x128xf32>
    %76 = arith.addf %72, %75 : vector<32x128xf32>
    %c1_50 = arith.constant 1 : index
    %c3_51 = arith.constant 3 : index
    %77 = memref.load %arg4[%c1_50, %c3_51] : memref<4x4xf32, #tpu.memory_space<smem>>
    %78 = vector.broadcast %77 : f32 to vector<32x128xf32>
    %79 = arith.mulf %78, %42 : vector<32x128xf32>
    %80 = arith.addf %76, %79 : vector<32x128xf32>
    %c0_52 = arith.constant 0 : index
    %c1_53 = arith.constant 1 : index
    %c0_54 = arith.constant 0 : index
    %c0_55 = arith.constant 0 : index
    %81 = vector.load %arg7[%c0_52, %c1_53, %c0_54, %c0_55] : memref<1x4x32x128xf32, #tpu.memory_space<vmem>>, vector<1x1x32x128xf32>
    %82 = vector.shape_cast %81 : vector<1x1x32x128xf32> to vector<32x128xf32>
    %83 = arith.index_cast %arg0 : i32 to index
    %c1_56 = arith.constant 1 : index
    %84 = memref.load %arg5[%83, %c1_56] : memref<2x4xf32, #tpu.memory_space<smem>>
    %85 = vector.broadcast %84 : f32 to vector<32x128xf32>
    %86 = arith.addf %80, %85 : vector<32x128xf32>
    %87 = arith.subf %82, %86 : vector<32x128xf32>
    %88 = math.absf %87 : vector<32x128xf32>
    %89 = arith.addf %65, %88 : vector<32x128xf32>
    %c2_57 = arith.constant 2 : index
    %c0_58 = arith.constant 0 : index
    %90 = memref.load %arg4[%c2_57, %c0_58] : memref<4x4xf32, #tpu.memory_space<smem>>
    %91 = vector.broadcast %90 : f32 to vector<32x128xf32>
    %92 = arith.mulf %91, %15 : vector<32x128xf32>
    %c2_59 = arith.constant 2 : index
    %c1_60 = arith.constant 1 : index
    %93 = memref.load %arg4[%c2_59, %c1_60] : memref<4x4xf32, #tpu.memory_space<smem>>
    %94 = vector.broadcast %93 : f32 to vector<32x128xf32>
    %95 = arith.mulf %94, %24 : vector<32x128xf32>
    %96 = arith.addf %92, %95 : vector<32x128xf32>
    %c2_61 = arith.constant 2 : index
    %c2_62 = arith.constant 2 : index
    %97 = memref.load %arg4[%c2_61, %c2_62] : memref<4x4xf32, #tpu.memory_space<smem>>
    %98 = vector.broadcast %97 : f32 to vector<32x128xf32>
    %99 = arith.mulf %98, %33 : vector<32x128xf32>
    %100 = arith.addf %96, %99 : vector<32x128xf32>
    %c2_63 = arith.constant 2 : index
    %c3_64 = arith.constant 3 : index
    %101 = memref.load %arg4[%c2_63, %c3_64] : memref<4x4xf32, #tpu.memory_space<smem>>
    %102 = vector.broadcast %101 : f32 to vector<32x128xf32>
    %103 = arith.mulf %102, %42 : vector<32x128xf32>
    %104 = arith.addf %100, %103 : vector<32x128xf32>
    %c0_65 = arith.constant 0 : index
    %c2_66 = arith.constant 2 : index
    %c0_67 = arith.constant 0 : index
    %c0_68 = arith.constant 0 : index
    %105 = vector.load %arg7[%c0_65, %c2_66, %c0_67, %c0_68] : memref<1x4x32x128xf32, #tpu.memory_space<vmem>>, vector<1x1x32x128xf32>
    %106 = vector.shape_cast %105 : vector<1x1x32x128xf32> to vector<32x128xf32>
    %107 = arith.index_cast %arg0 : i32 to index
    %c2_69 = arith.constant 2 : index
    %108 = memref.load %arg5[%107, %c2_69] : memref<2x4xf32, #tpu.memory_space<smem>>
    %109 = vector.broadcast %108 : f32 to vector<32x128xf32>
    %110 = arith.addf %104, %109 : vector<32x128xf32>
    %111 = arith.subf %106, %110 : vector<32x128xf32>
    %112 = math.absf %111 : vector<32x128xf32>
    %113 = arith.addf %89, %112 : vector<32x128xf32>
    %c3_70 = arith.constant 3 : index
    %c0_71 = arith.constant 0 : index
    %114 = memref.load %arg4[%c3_70, %c0_71] : memref<4x4xf32, #tpu.memory_space<smem>>
    %115 = vector.broadcast %114 : f32 to vector<32x128xf32>
    %116 = arith.mulf %115, %15 : vector<32x128xf32>
    %c3_72 = arith.constant 3 : index
    %c1_73 = arith.constant 1 : index
    %117 = memref.load %arg4[%c3_72, %c1_73] : memref<4x4xf32, #tpu.memory_space<smem>>
    %118 = vector.broadcast %117 : f32 to vector<32x128xf32>
    %119 = arith.mulf %118, %24 : vector<32x128xf32>
    %120 = arith.addf %116, %119 : vector<32x128xf32>
    %c3_74 = arith.constant 3 : index
    %c2_75 = arith.constant 2 : index
    %121 = memref.load %arg4[%c3_74, %c2_75] : memref<4x4xf32, #tpu.memory_space<smem>>
    %122 = vector.broadcast %121 : f32 to vector<32x128xf32>
    %123 = arith.mulf %122, %33 : vector<32x128xf32>
    %124 = arith.addf %120, %123 : vector<32x128xf32>
    %c3_76 = arith.constant 3 : index
    %c3_77 = arith.constant 3 : index
    %125 = memref.load %arg4[%c3_76, %c3_77] : memref<4x4xf32, #tpu.memory_space<smem>>
    %126 = vector.broadcast %125 : f32 to vector<32x128xf32>
    %127 = arith.mulf %126, %42 : vector<32x128xf32>
    %128 = arith.addf %124, %127 : vector<32x128xf32>
    %c0_78 = arith.constant 0 : index
    %c3_79 = arith.constant 3 : index
    %c0_80 = arith.constant 0 : index
    %c0_81 = arith.constant 0 : index
    %129 = vector.load %arg7[%c0_78, %c3_79, %c0_80, %c0_81] : memref<1x4x32x128xf32, #tpu.memory_space<vmem>>, vector<1x1x32x128xf32>
    %130 = vector.shape_cast %129 : vector<1x1x32x128xf32> to vector<32x128xf32>
    %131 = arith.index_cast %arg0 : i32 to index
    %c3_82 = arith.constant 3 : index
    %132 = memref.load %arg5[%131, %c3_82] : memref<2x4xf32, #tpu.memory_space<smem>>
    %133 = vector.broadcast %132 : f32 to vector<32x128xf32>
    %134 = arith.addf %128, %133 : vector<32x128xf32>
    %135 = arith.subf %130, %134 : vector<32x128xf32>
    %136 = math.absf %135 : vector<32x128xf32>
    %137 = arith.addf %113, %136 : vector<32x128xf32>
    %c0_83 = arith.constant 0 : index
    %c0_84 = arith.constant 0 : index
    %c0_85 = arith.constant 0 : index
    %c0_86 = arith.constant 0 : index
    %138 = vector.load %arg8[%c0_83, %c0_84, %c0_85, %c0_86] : memref<1x1x32x128xf32, #tpu.memory_space<vmem>>, vector<1x1x32x128xf32>
    %139 = vector.shape_cast %138 : vector<1x1x32x128xf32> to vector<32x128xf32>
    %140 = arith.addf %139, %137 : vector<32x128xf32>
    %c0_87 = arith.constant 0 : index
    %c0_88 = arith.constant 0 : index
    %c0_89 = arith.constant 0 : index
    %c0_90 = arith.constant 0 : index
    %141 = vector.load %arg8[%c0_87, %c0_88, %c0_89, %c0_90] : memref<1x1x32x128xf32, #tpu.memory_space<vmem>>, vector<1x1x32x128xf32>
    %142 = vector.shape_cast %141 : vector<1x1x32x128xf32> to vector<32x128xf32>
    %143 = vector.shape_cast %140 : vector<32x128xf32> to vector<1x1x32x128xf32>
    tpu.vector_store %arg8[%c0_87, %c0_88, %c0_89, %c0_90], %143 {strides = array<i32>} : memref<1x1x32x128xf32, #tpu.memory_space<vmem>>, vector<1x1x32x128xf32>,
    return
  }
  func.func @transform_0(%arg0: i32, %arg1: i32, %arg2: i32) -> (i32, i32) {
    %c0_i32 = arith.constant 0 : i32
    %c0_i32_0 = arith.constant 0 : i32
    %c0_i32_1 = arith.constant 0 : i32
    return %c0_i32, %c0_i32_0 : i32, i32
  }
  func.func @transform_1(%arg0: i32, %arg1: i32, %arg2: i32) -> (i32, i32) {
    %c0_i32 = arith.constant 0 : i32
    %c0_i32_0 = arith.constant 0 : i32
    %c0_i32_1 = arith.constant 0 : i32
    return %c0_i32, %c0_i32_0 : i32, i32
  }
  func.func @transform_2(%arg0: i32, %arg1: i32, %arg2: i32) -> (i32, i32) {
    %c0_i32 = arith.constant 0 : i32
    %c0_i32_0 = arith.constant 0 : i32
    %c0_i32_1 = arith.constant 0 : i32
    return %c0_i32, %c0_i32_0 : i32, i32
  }
  func.func @transform_3(%arg0: i32, %arg1: i32, %arg2: i32) -> (i32, i32, i32, i32) {
    %c1_i32 = arith.constant 1 : i32
    %0 = arith.muli %arg1, %c1_i32 : i32
    %1 = arith.addi %0, %arg2 : i32
    %c0_i32 = arith.constant 0 : i32
    %c0_i32_0 = arith.constant 0 : i32
    %c0_i32_1 = arith.constant 0 : i32
    return %arg0, %c0_i32, %1, %c0_i32_0 : i32, i32, i32, i32
  }
  func.func @transform_4(%arg0: i32, %arg1: i32, %arg2: i32) -> (i32, i32, i32, i32) {
    %c1_i32 = arith.constant 1 : i32
    %0 = arith.muli %arg1, %c1_i32 : i32
    %1 = arith.addi %0, %arg2 : i32
    %c0_i32 = arith.constant 0 : i32
    %c0_i32_0 = arith.constant 0 : i32
    %c0_i32_1 = arith.constant 0 : i32
    return %arg0, %c0_i32, %1, %c0_i32_0 : i32, i32, i32, i32
  }
  func.func @transform_5(%arg0: i32, %arg1: i32, %arg2: i32) -> (i32, i32, i32, i32) {
    %c0_i32 = arith.constant 0 : i32
    %c0_i32_0 = arith.constant 0 : i32
    %c0_i32_1 = arith.constant 0 : i32
    return %arg0, %arg1, %c0_i32, %c0_i32_0 : i32, i32, i32, i32
  }
}

</mosaic_0001>

<bundles_post_ra>
// kernel: tpu_custom_call.1
= control target key start
LH: loop header
LB: loop body
LE: loop exit
PB: predicated region body
PF: predicated region fallthrough
CT: control target
= control target key end

     0   :  { %s1798_s0 = inlined_call_operand.hbm [shape: f32[2,2], index: 0, kind: input, shape index: {}]   ;;  %s1799_s1 = inlined_call_operand.hbm [shape: f32[4,4], index: 1, kind: input, shape index: {}]   ;;  %s1800_s2 = inlined_call_operand.hbm [shape: f32[2,4], index: 2, kind: input, shape index: {}]   ;;  %s1801_s3 = inlined_call_operand.hbm [shape: f32[2,4,32,128], index: 3, kind: input, shape index: {}]   ;;  %s1802_s4 = inlined_call_operand.hbm [shape: f32[2,4,32,128], index: 4, kind: input, shape index: {}]   ;;  %s1803_s5 = inlined_call_operand.hbm [shape: f32[2,1,32,128], index: 5, kind: output, shape index: {}]  }
   0x1   :  { %1806 = sst [smem:[#allocation20_spill]] %s1798_s0 }
   0x2   :  { %1807 = sst [smem:[#allocation21_spill]] %s1799_s1 }
   0x3   :  { %1808 = sst [smem:[#allocation22_spill]] %s1800_s2 }
   0x4   :  { %10 = vsyncpa [#allocation5], 0 }
   0x5   :  { %11 = vsyncpa [#allocation7], 0 }
   0x6   :  { %12 = vsyncpa [#allocation3], 0 }
   0x7   :  { %14 = vsyncpa [#allocation3 + $0x1], 0 }
   0x8   :  { %15 = vsyncpa [#allocation11], 0 }
   0x9   :  { %17 = vsyncpa [#allocation11 + $0x1], 0 }
   0xa   :  { %18 = vsyncpa [#allocation4], 0 }
   0xb   :  { %20 = vsyncpa [#allocation4 + $0x1], 0  ;;  %s1267_s18 = smov 0   ;;  %s1269_s19 = smov 0  }
   0xc   :  { %s1271_s20 = smov 0   ;;  %s1273_s21 = smov 0  }
   0xd   :  { %s1275_s22 = smov 0   ;;  %s1277_s23 = smov 0  }
   0xe LB: > { %1809 = sst [smem:[#allocation18_spill]] %s1224_s22  ;;  %s858_s24 = sadd.s32 4294967295, %s1228_s23   ;;  %s1228_s23 = sphi %s1277_s23, %s26_s23   ;;  %s1224_s22 = sphi %s1275_s22, %s1822_s22   ;;  %s1220_s21 = sphi %s1273_s21, %s1821_s21   ;;  %s1216_s20 = sphi %s1271_s20, %s1825_s20   ;;  %s1212_s19 = sphi %s1269_s19, %s1824_s19   ;;  %s1208_s18 = sphi %s1267_s18, %s1823_s18  }
   0xf   : > { %s859_s25 = sadd.s32 4294967294, %s1228_s23   ;;  %p132_p0 = scmp.ne.s32.totalorder %s1212_s19, %s1208_s18 }
  0x10   : > { %p1301_p1 = scmp.eq.s32.totalorder %s858_s24, 0  ;;  %p1305_p2 = scmp.eq.s32.totalorder %s858_s24, 1 }
  0x11   : > { %p194_p3 = scmp.eq.s32.totalorder %s859_s25, 1  ;;  %p860_p5 = scmp.ge.s32.totalorder %s1228_s23, 1 }
  0x12   : > { %p1311_p4 = por %p1301_p1, %p132_p0  ;;  %p201_p7 = scmp.lt.s32.totalorder %s1228_s23, 3 }
  0x13   : > { %p1316_p6 = por %p194_p3, %p132_p0  ;;  %s1814_s1 = sld [smem:[#allocation21_spill]] }
  0x14   : > { %p1324_p8 = pnand %p860_p5, %p201_p7  ;;  %p864_p9 = scmp.ge.s32.totalorder %s1228_s23, 2 }
  0x15   : > { %s1816_s0 = sld [smem:[#allocation20_spill]]  ;;  %s1230_s15 = smov [#allocation6]  }
  0x16   : > { %p944_p10 = pneg %p1324_p8  ;;  %s1817_s2 = sld [smem:[#allocation22_spill]] }
  0x17   : > { %s1231_s16 = smov [#allocation2]   ;;  %s1232_s17 = smov [#allocation8]  }
  0x18   : > { %p945_p11 = pnand %p944_p10, %p1301_p1  ;;  %s119_s24 = sadd.s32 1, %s1216_s20 }
  0x19   : > { %s223_s7 = sshll.u32 %s1814_s1, 4  ;;  %s45_s25 = sadd.s32 1, %s1224_s22  ;;  %s224_s7 = int_to_ptr.hbm [resolvable:$true] %s223_s7 }
  0x1a   : > { %950 = dma.hbm_to_smem (!%p945_p11), %s224_s7, 64, %s1230_s15, [#allocation7]  }
  0x1b   : > { %s213_s11 = sshll.u32 %s1816_s0, 4  ;;  %p126_p12 = scmp.ne.s32.totalorder %s1216_s20, %s1212_s19  ;;  %s214_s11 = int_to_ptr.hbm [resolvable:$true] %s213_s11 }
  0x1c   : > { %s233_s14 = sshll.u32 %s1817_s2, 4  ;;  %p47_p13 = scmp.ge.s32.totalorder %s45_s25, 2  ;;  %s234_s14 = int_to_ptr.hbm [resolvable:$true] %s233_s14 }
  0x1d   : > { %947 = dma.hbm_to_smem (!%p945_p11), %s214_s11, 32, %s1231_s16, [#allocation5]  }
  0x1e   : > { %953 = dma.hbm_to_smem (!%p945_p11), %s234_s14, 32, %s1232_s17, [#allocation7]  }
  0x1f   : > { %p127_p0 = scmp.eq.s32.totalorder %s1228_s23, 0  ;;  %p1346_p3 = por %p1305_p2, %p126_p12 }
  0x20   : > { %p968_p5 = scmp.lt.s32.totalorder %s1228_s23, 2  ;;  %s1827_s25 = smov (%p47_p13, %s45_s25), 0 }
  0x21   : > { %1819 = sst [smem:[#allocation19_spill]] %s1827_s25  ;;  %p1353_p7 = por %p127_p0, %p126_p12 }
  0x22   : > { %s1358_s7 = sand.u32 1, %s1216_s20   ;;  %s114_s9 = ssub.s32 %s1224_s22, %s1827_s25 }
  0x23   : > { %p117_p10 = scmp.eq.s32.totalorder %s114_s9, 0  ;;  %s865_s27 = sshll.u32 %s1358_s7, 7 }
  0x24   : > { %s923_s10 = sshll.u32 %s1224_s22, 7  ;;  %s248_s15 = scalar_lea.vmem [#allocation9], %s865_s27 }
  0x25   : > { %s1365_s11 = scalar_select %p117_p10, %s1216_s20, %s119_s24  }
  0x26   : > { %s256_s14 = scalar_lea.hbm %s1801_s3, %s923_s10  ;;  %s259_s16 = sshll.u32 %s248_s15, 4  ;;  %s260_s16 = int_to_ptr.vmem [resolvable:$true] %s259_s16 }
  0x27   : > { %s257_s17 = sshll.u32 %s256_s14, 4  ;;  %p955_p2 = pnand %p968_p5, %p1353_p7  ;;  %s258_s17 = int_to_ptr.hbm [resolvable:$true] %s257_s17 }
  0x28   : > { %s245_s0 = scalar_lea.sflag [#allocation3], %s1358_s7  ;;  %s1233_s1 = smov 128  }
  0x29   : > { %s1234_s9 = smov 8   ;;  %s281_s25 = scalar_lea.hbm %s1802_s4, %s923_s10 }
  0x2a   : > { %957 = dma.hbm_to_vmem [thread:$0]  (!%p955_p2), %s258_s17, 2048, %s260_s16, %s245_s0, %s1233_s1, %s1233_s1, %s1234_s9  }
  0x2b   : > { %s282_s22 = sshll.u32 %s281_s25, 4  ;;  %s273_s12 = scalar_lea.vmem [#allocation10], %s865_s27  ;;  %s283_s22 = int_to_ptr.hbm [resolvable:$true] %s282_s22 }
  0x2c   : > { %s284_s13 = sshll.u32 %s273_s12, 4  ;;  %s270_s15 = scalar_lea.sflag [#allocation11], %s1358_s7  ;;  %s285_s13 = int_to_ptr.vmem [resolvable:$true] %s284_s13 }
  0x2d   : > { %960 = dma.hbm_to_vmem [thread:$0]  (!%p955_p2), %s283_s22, 2048, %s285_s13, %s270_s15, %s1233_s1, %s1233_s1, %s1234_s9  }
  0x2e   : > { %296 = sbr.rel (%p1324_p8) target bundleno = 143 (0x8f), region = 40 }
  0x33   : > { %1187 = dma.done.wait (%p1301_p1), [#allocation5], 32  }
  0x34   : > { %1189 = vsyncadd (%p1301_p1), [#allocation5], 4294967264 }
  0x35   : > { %1191 = dma.done.wait (%p1301_p1), [#allocation7], 96  }
  0x36   : > { %1193 = vsyncadd (%p1301_p1), [#allocation7], 4294967200  ;;  %s1390_s0 = sand.u32 1, %s1212_s19  }
  0x37   : > { %s875_s1 = sshll.u32 %s1390_s0, 7  ;;  %s314_s2 = scalar_lea.sflag [#allocation3], %s1390_s0 }
  0x38   : > { %s1394_s22 = scalar_lea.vmem [#allocation9], %s875_s1 }
  0x39   : > { %1195 = dma.done.wait (%p1311_p4), %s314_s2, 2048  }
  0x3a   : > { %1197 = vsyncadd (%p1311_p4), %s314_s2, 4294965248  ;;  %s324_s8 = scalar_lea.sflag [#allocation11], %s1390_s0  ;;  %s1401_s26 = scalar_lea.vmem [#allocation10], %s875_s1 }
  0x3b   : > { %1199 = dma.done.wait (%p1311_p4), %s324_s8, 2048  }
  0x3c   : > { %1201 = vsyncadd (%p1311_p4), %s324_s8, 4294965248 }
  0x3d   : > { %333 = sfence }
  0x3e   : > { %s1408_s25 = sshll.u32 %s1220_s21, 7  ;;  %s465_s28 = sld [smem:[#allocation6]]  ;;  %v377_v0 = vld [vmem:[%s1394_s22] sm:$0xff]  ;;  %v378_v5 = vld [vmem:[%s1394_s22 + $0x8] sm:$0xff] }
  0x3f   : > { %s374_s6 = sld [smem:[#allocation2 + %s1408_s25]]  ;;  %s375_s7 = sadd.s32 1, %s1408_s25  ;;  %v879_v1 = vld [vmem:[%s1394_s22 + $0x20] sm:$0xff]  ;;  %v880_v6 = vld [vmem:[%s1394_s22 + $0x28] sm:$0xff] }
  0x40   : > { %s376_s27 = sld [smem:[#allocation2 + %s375_s7]]  ;;  %v887_v2 = vld [vmem:[%s1394_s22 + $0x40] sm:$0xff]  ;;  %v1448_v15 = vld [vmem:[%s1401_s26 + $0x8] sm:$0xff]  ;;  %s605_s8 = sadd.s32 2, %s1408_s25 }
  0x41   : > { %s1415_s10 = sld [smem:[#allocation6 + $0x1]]  ;;  %v895_v3 = vld [vmem:[%s1394_s22 + $0x60] sm:$0xff]  ;;  %v1451_v16 = vld [vmem:[%s1401_s26 + $0x28] sm:$0xff] }
  0x42   : > { %s904_s14 = sld [smem:[#allocation6 + $0x2]]  ;;  %v1421_v4 = vld [vmem:[%s1401_s26] sm:$0xff]  ;;  %v888_v33 = vld [vmem:[%s1394_s22 + $0x48] sm:$0xff] }
  0x43   : > { %s1423_s16 = sld [smem:[#allocation6 + $0x3]]  ;;  %v1430_v8 = vld [vmem:[%s1401_s26 + $0x20] sm:$0xff]  ;;  %v1496_v34 = vld [vmem:[%s1401_s26 + $0x48] sm:$0xff] }
  0x44   : > { %v1433_v9 = vld [vmem:[%s1401_s26 + $0x40] sm:$0xff]  ;;  %s1439_s17 = sld [smem:[#allocation8 + %s1408_s25]]  ;;  %v1455_v18 = vstv %s465_s28  ;;  %v896_v43 = vld [vmem:[%s1394_s22 + $0x68] sm:$0xff] }
  0x45   : > { %v1427_v7 = vstv %s374_s6  ;;  %v1436_v10 = vld [vmem:[%s1401_s26 + $0x60] sm:$0xff]  ;;  %s1445_s9 = sld [smem:[#allocation6 + $0x80]]  ;;  %v1543_v52 = vld [vmem:[%s1401_s26 + $0x68] sm:$0xff] }
  0x46   : > { %v382_v11 = vmul.f32 %v1427_v7, %v377_v0  ;;  %v404_v12 = vmul.f32 %v879_v1, %v1427_v7  ;;  %v426_v13 = vmul.f32 %v887_v2, %v1427_v7  ;;  %v448_v14 = vmul.f32 %v895_v3, %v1427_v7  ;;  %s1457_s24 = sld [smem:[#allocation6 + $0x81]] }
  0x47   : > { %v1453_v17 = vstv %s376_s27  ;;  %v383_v19 = vmul.f32 %v1427_v7, %v378_v5  ;;  %v405_v20 = vmul.f32 %v880_v6, %v1427_v7  ;;  %s1469_s12 = sld [smem:[#allocation6 + $0x82]]  ;;  %v1472_v25 = vstv %s1415_s10 }
  0x48   : > { %v391_v21 = vmul.f32 %v1453_v17, %v1421_v4  ;;  %v413_v22 = vmul.f32 %v1430_v8, %v1453_v17  ;;  %v435_v23 = vmul.f32 %v1433_v9, %v1453_v17  ;;  %v457_v24 = vmul.f32 %v1436_v10, %v1453_v17  ;;  %s1476_s13 = sld [smem:[#allocation6 + $0x83]] }
  0x49   : > { %v1474_v26 = vstv %s904_s14  ;;  %v392_v27 = vmul.f32 %v1453_v17, %v1448_v15  ;;  %v414_v28 = vmul.f32 %v1451_v16, %v1453_v17  ;;  %s1492_s15 = sld [smem:[#allocation8 + %s375_s7]]  ;;  %v1499_v35 = vstv %s1423_s16  ;;  %s660_s14 = sadd.s32 3, %s1408_s25 }
  0x4a   : > { %v1482_v29 = vadd.f32 %v391_v21, %v382_v11  ;;  %v1484_v30 = vadd.f32 %v413_v22, %v404_v12  ;;  %v1486_v31 = vadd.f32 %v435_v23, %v426_v13  ;;  %v1488_v32 = vadd.f32 %v457_v24, %v448_v14  ;;  %s1504_s1 = sld [smem:[#allocation6 + $0x100]] }
  0x4b   : > { %v1502_v36 = vstv %s1439_s17  ;;  %v1506_v37 = vadd.f32 %v392_v27, %v383_v19  ;;  %v1508_v38 = vadd.f32 %v414_v28, %v405_v20  ;;  %s1518_s2 = sld [smem:[#allocation6 + $0x101]]  ;;  %v1523_v44 = vstv %s1445_s9  ;;  %s877_s9 = sshll.u32 %s1390_s0, 5 }
  0x4c   : > { %v467_v39 = vmul.f32 %v1455_v18, %v1482_v29  ;;  %v473_v40 = vmul.f32 %v1472_v25, %v1484_v30  ;;  %v483_v41 = vmul.f32 %v1474_v26, %v1486_v31  ;;  %v493_v42 = vmul.f32 %v1499_v35, %v1488_v32  ;;  %s1528_s6 = sld [smem:[#allocation6 + $0x102]] }
  0x4d   : > { %v1526_v45 = vstv %s1457_s24  ;;  %v427_v46 = vmul.f32 %v888_v33, %v1427_v7  ;;  %v436_v47 = vmul.f32 %v1496_v34, %v1453_v17  ;;  %v517_v49 = vmul.f32 %v1523_v44, %v1482_v29  ;;  %s1540_s7 = sld [smem:[#allocation6 + $0x103]]  ;;  %s1680_s24 = scalar_lea.vmem [#allocation12], %s877_s9 }
  0x4e   : > { %v477_v48 = vadd.f32 %v473_v40, %v467_v39  ;;  %v523_v50 = vmul.f32 %v1526_v45, %v1484_v30  ;;  %v1538_v51 = vstv %s1469_s12  ;;  %v1548_v54 = vstv %s1476_s13  ;;  %s1550_s28 = sld [smem:[#allocation8 + %s605_s8]] }
  0x4f   : > { %v533_v53 = vmul.f32 %v1538_v51, %v1486_v31  ;;  %v1552_v55 = vadd.f32 %v436_v47, %v427_v46  ;;  %v449_v56 = vmul.f32 %v896_v43, %v1427_v7  ;;  %v543_v59 = vmul.f32 %v1548_v54, %v1488_v32  ;;  %s914_s27 = sld [smem:[#allocation6 + $0x180]] }
  0x50   : > { %v487_v57 = vadd.f32 %v483_v41, %v477_v48  ;;  %v527_v58 = vadd.f32 %v523_v50, %v517_v49  ;;  %v1558_v60 = vstv %s1492_s15  ;;  %v1561_v61 = vstv %s1504_s1  ;;  %s915_s10 = sld [smem:[#allocation6 + $0x181]]  ;;  %s706_s15 = sshll.u32 %s1680_s24, 4  ;;  %s707_s15 = int_to_ptr.vmem [resolvable:$true] %s706_s15 }
  0x51   : > { %v458_v62 = vmul.f32 %v1543_v52, %v1453_v17  ;;  %v468_v63 = vmul.f32 %v1455_v18, %v1506_v37  ;;  %v474_v0 = vmul.f32 %v1472_v25, %v1508_v38  ;;  %v571_v3 = vmul.f32 %v1561_v61, %v1482_v29  ;;  %s916_s16 = sld [smem:[#allocation6 + $0x182]] }
  0x52   : > { %v497_v1 = vadd.f32 %v493_v42, %v487_v57  ;;  %v537_v2 = vadd.f32 %v533_v53, %v527_v58  ;;  %v1573_v5 = vstv %s1518_s2  ;;  %v1578_v11 = vstv %s1528_s6  ;;  %s917_s25 = sld [smem:[#allocation6 + $0x183]] }
  0x53   : > { %v577_v6 = vmul.f32 %v1573_v5, %v1484_v30  ;;  %v462_v12 = vadd.f32 %v458_v62, %v449_v56  ;;  %v478_v13 = vadd.f32 %v474_v0, %v468_v63  ;;  %v587_v20 = vmul.f32 %v1578_v11, %v1486_v31  ;;  %s661_s17 = sld [smem:[#allocation8 + %s660_s14]] }
  0x54   : > { %v503_v14 = vadd.f32 %v1502_v36, %v497_v1  ;;  %v547_v19 = vadd.f32 %v543_v59, %v537_v2  ;;  %v1584_v21 = vstv %s1540_s7  ;;  %v1589_v24 = vstv %s1550_s28  ;;  %s1154_s28 = scalar_lea.hbm %s1803_s5, 64 }
  0x55   : > { %v581_v22 = vadd.f32 %v577_v6, %v571_v3  ;;  %v597_v23 = vmul.f32 %v1584_v21, %v1488_v32  ;;  %v484_v27 = vmul.f32 %v1474_v26, %v1552_v55  ;;  %v1595_v39 = vstv %s914_s27 }
  0x56   : > { %v507_v28 = vsub.f32 %v1421_v4, %v503_v14  ;;  %v553_v33 = vadd.f32 %v1558_v60, %v547_v19  ;;  %v494_v40 = vmul.f32 %v1499_v35, %v462_v12  ;;  %v626_v42 = vmul.f32 %v1595_v39, %v1482_v29 }
  0x57   : > { %v591_v41 = vadd.f32 %v587_v20, %v581_v22  ;;  %v1600_v43 = vstv %s915_s10  ;;  %v488_v46 = vadd.f32 %v484_v27, %v478_v13  ;;  %v1605_v4 = vstv %s916_s16  ;;  %v379_v27 = vld [vmem:[%s1394_s22 + $0x10] sm:$0xff] }
  0x58   : > { %v511_v47 = vand.u32 2147483647, %v507_v28  ;;  %v557_v48 = vsub.f32 %v1430_v8, %v553_v33  ;;  %v632_v49 = vmul.f32 %v1600_v43, %v1484_v30  ;;  %v642_v53 = vmul.f32 %v1605_v4, %v1486_v31 }
  0x59   : > { %v601_v50 = vadd.f32 %v597_v23, %v591_v41  ;;  %v1609_v56 = vstv %s917_s25  ;;  %v498_v57 = vadd.f32 %v494_v40, %v488_v46  ;;  %v1613_v62 = vstv %s661_s17  ;;  %v1637_v40 = vld [vmem:[%s1401_s26 + $0x10] sm:$0xff] }
  0x5a   : > { %v561_v58 = vand.u32 2147483647, %v557_v48  ;;  %v636_v29 = vadd.f32 %v632_v49, %v626_v42  ;;  %v652_v59 = vmul.f32 %v1609_v56, %v1488_v32  ;;  %v518_v63 = vmul.f32 %v1523_v44, %v1506_v37  ;;  %v881_v48 = vld [vmem:[%s1394_s22 + $0x30] sm:$0xff] }
  0x5b   : > { %v608_v8 = vadd.f32 %v1589_v24, %v601_v50  ;;  %v504_v30 = vadd.f32 %v1502_v36, %v498_v57  ;;  %v524_v31 = vmul.f32 %v1526_v45, %v1508_v38  ;;  %v534_v2 = vmul.f32 %v1538_v51, %v1552_v55  ;;  %v1646_v49 = vld [vmem:[%s1401_s26 + $0x30] sm:$0xff] }
  0x5c   : > { %v565_v0 = vadd.f32 %v561_v58, %v511_v47  ;;  %v646_v1 = vadd.f32 %v642_v53, %v636_v29  ;;  %v544_v32 = vmul.f32 %v1548_v54, %v462_v12  ;;  %v572_v14 = vmul.f32 %v1561_v61, %v1506_v37  ;;  %v889_v50 = vld [vmem:[%s1394_s22 + $0x50] sm:$0xff] }
  0x5d   : > { %v612_v3 = vsub.f32 %v1433_v9, %v608_v8  ;;  %v508_v6 = vsub.f32 %v1448_v15, %v504_v30  ;;  %v528_v13 = vadd.f32 %v524_v31, %v518_v63  ;;  %v578_v20 = vmul.f32 %v1573_v5, %v1508_v38  ;;  %v897_v30 = vld [vmem:[%s1394_s22 + $0x70] sm:$0xff] }
  0x5e   : > { %v656_v19 = vadd.f32 %v652_v59, %v646_v1  ;;  %v588_v22 = vmul.f32 %v1578_v11, %v1552_v55  ;;  %v598_v23 = vmul.f32 %v1584_v21, %v462_v12  ;;  %v627_v33 = vmul.f32 %v1595_v39, %v1506_v37  ;;  %v1664_v1 = vld [vmem:[%s1401_s26 + $0x70] sm:$0xff] }
  0x5f   : > { %v616_v9 = vand.u32 2147483647, %v612_v3  ;;  %v512_v28 = vand.u32 2147483647, %v508_v6  ;;  %v538_v15 = vadd.f32 %v534_v2, %v528_v13  ;;  %v582_v42 = vadd.f32 %v578_v20, %v572_v14 }
  0x60   : > { %v663_v41 = vadd.f32 %v1613_v62, %v656_v19  ;;  %v633_v46 = vmul.f32 %v1600_v43, %v1508_v38  ;;  %v643_v47 = vmul.f32 %v1605_v4, %v1552_v55  ;;  %v653_v57 = vmul.f32 %v1609_v56, %v462_v12  ;;  %v1655_v55 = vld [vmem:[%s1401_s26 + $0x50] sm:$0xff] }
  0x61   : > { %v620_v37 = vadd.f32 %v616_v9, %v565_v0  ;;  %v548_v53 = vadd.f32 %v544_v32, %v538_v15  ;;  %v384_v58 = vmul.f32 %v1427_v7, %v379_v27  ;;  %v592_v59 = vadd.f32 %v588_v22, %v582_v42 }
  0x62   : > { %v667_v29 = vsub.f32 %v1436_v10, %v663_v41  ;;  %v637_v8 = vadd.f32 %v633_v46, %v627_v33  ;;  %v393_v38 = vmul.f32 %v1453_v17, %v1637_v40  ;;  %v406_v31 = vmul.f32 %v881_v48, %v1427_v7 }
  0x63   : > { %v554_v63 = vadd.f32 %v1558_v60, %v548_v53  ;;  %v415_v0 = vmul.f32 %v1646_v49, %v1453_v17  ;;  %v428_v12 = vmul.f32 %v889_v50, %v1427_v7  ;;  %v602_v2 = vadd.f32 %v598_v23, %v592_v59 }
  0x64   : > { %v671_v10 = vand.u32 2147483647, %v667_v29  ;;  %v647_v32 = vadd.f32 %v643_v47, %v637_v8  ;;  %v397_v3 = vadd.f32 %v393_v38, %v384_v58  ;;  %v437_v14 = vmul.f32 %v1655_v55, %v1453_v17 }
  0x65   : > { %v558_v6 = vsub.f32 %v1451_v16, %v554_v63  ;;  %v419_v13 = vadd.f32 %v415_v0, %v406_v31  ;;  %v450_v19 = vmul.f32 %v897_v30, %v1427_v7  ;;  %v609_v22 = vadd.f32 %v1589_v24, %v602_v2 }
  0x66   : > { %v675_v20 = vadd.f32 %v671_v10, %v620_v37  ;;  %v657_v27 = vadd.f32 %v653_v57, %v647_v32  ;;  %v459_v9 = vmul.f32 %v1664_v1, %v1453_v17  ;;  %v441_v33 = vadd.f32 %v437_v14, %v428_v12 }
  0x67   : > { %v562_v15 = vand.u32 2147483647, %v558_v6  ;;  %v469_v23 = vmul.f32 %v1455_v18, %v397_v3  ;;  %v475_v41 = vmul.f32 %v1472_v25, %v419_v13  ;;  %v613_v16 = vsub.f32 %v1496_v34, %v609_v22  ;;  %v882_v22 = vld [vmem:[%s1394_s22 + $0x38] sm:$0xff] }
  0x68   : > { %v664_v42 = vadd.f32 %v1613_v62, %v657_v27  ;;  %v463_v46 = vadd.f32 %v459_v9, %v450_v19  ;;  %v485_v50 = vmul.f32 %v1474_v26, %v441_v33  ;;  %v519_v37 = vmul.f32 %v1523_v44, %v397_v3  ;;  %687 = vst [vmem:[%s1680_s24] sm:$0xff] %v675_v20  ;;  %v1696_v20 = vld [vmem:[%s1401_s26 + $0x18] sm:$0xff] }
  0x69   : > { %v566_v47 = vadd.f32 %v562_v15, %v512_v28  ;;  %v479_v48 = vadd.f32 %v475_v41, %v469_v23  ;;  %v617_v53 = vand.u32 2147483647, %v613_v16  ;;  %v525_v34 = vmul.f32 %v1526_v45, %v419_v13  ;;  %v1700_v27 = vld [vmem:[%s1401_s26 + $0x38] sm:$0xff] }
  0x6a   : > { %v668_v57 = vsub.f32 %v1543_v52, %v664_v42  ;;  %v495_v58 = vmul.f32 %v1499_v35, %v463_v46  ;;  %v535_v28 = vmul.f32 %v1538_v51, %v441_v33  ;;  %v545_v59 = vmul.f32 %v1548_v54, %v463_v46  ;;  %v380_v52 = vld [vmem:[%s1394_s22 + $0x18] sm:$0xff] }
  0x6b   : > { %v489_v29 = vadd.f32 %v485_v50, %v479_v48  ;;  %v573_v8 = vmul.f32 %v1561_v61, %v397_v3  ;;  %v621_v38 = vadd.f32 %v617_v53, %v566_v47  ;;  %v529_v63 = vadd.f32 %v525_v34, %v519_v37  ;;  %v890_v41 = vld [vmem:[%s1394_s22 + $0x58] sm:$0xff] }
  0x6c   : > { %v672_v30 = vand.u32 2147483647, %v668_v57  ;;  %v579_v31 = vmul.f32 %v1573_v5, %v419_v13  ;;  %v589_v12 = vmul.f32 %v1578_v11, %v441_v33  ;;  %v599_v10 = vmul.f32 %v1584_v21, %v463_v46  ;;  %v1708_v47 = vld [vmem:[%s1401_s26 + $0x58] sm:$0xff] }
  0x6d   : > { %v499_v0 = vadd.f32 %v495_v58, %v489_v29  ;;  %v628_v2 = vmul.f32 %v1595_v39, %v397_v3  ;;  %v539_v6 = vadd.f32 %v535_v28, %v529_v63  ;;  %v634_v19 = vmul.f32 %v1600_v43, %v419_v13  ;;  %v1721_v29 = vld [vmem:[%s1401_s26 + $0x78] sm:$0xff] }
  0x6e   : > { %v676_v32 = vadd.f32 %v672_v30, %v621_v38  ;;  %v583_v14 = vadd.f32 %v579_v31, %v573_v8  ;;  %v644_v15 = vmul.f32 %v1605_v4, %v441_v33  ;;  %v654_v23 = vmul.f32 %v1609_v56, %v463_v46  ;;  %v898_v46 = vld [vmem:[%s1394_s22 + $0x78] sm:$0xff]  ;;  %s925_s22 = sshll.u32 %s1220_s21, 5  ;;  %s692_s21 = scalar_lea.sflag [#allocation4], %s1390_s0 }
  0x6f   : > { %v505_v9 = vadd.f32 %v1502_v36, %v499_v0  ;;  %v385_v3 = vmul.f32 %v1427_v7, %v380_v52  ;;  %v549_v16 = vadd.f32 %v545_v59, %v539_v6  ;;  %v638_v13 = vadd.f32 %v634_v19, %v628_v2  ;;  %s705_s13 = scalar_lea.hbm %s1803_s5, %s925_s22 }
  0x70   : > { %v593_v42 = vadd.f32 %v589_v12, %v583_v14  ;;  %v394_v50 = vmul.f32 %v1453_v17, %v1696_v20  ;;  %v407_v37 = vmul.f32 %v882_v22, %v1427_v7  ;;  %v416_v33 = vmul.f32 %v1700_v27, %v1453_v17  ;;  %688 = vst [vmem:[%s1680_s24 + $0x8] sm:$0xff] %v676_v32  ;;  %s708_s1 = sshll.u32 %s705_s13, 4  ;;  %s709_s1 = int_to_ptr.hbm [resolvable:$true] %s708_s1 }
  0x71   : > { %v509_v48 = vsub.f32 %v1637_v40, %v505_v9  ;;  %v555_v53 = vadd.f32 %v1558_v60, %v549_v16  ;;  %v648_v58 = vadd.f32 %v644_v15, %v638_v13  ;;  %v429_v34 = vmul.f32 %v890_v41, %v1427_v7  ;;  %s1148_s2 = sshra.s32 %s709_s1, 4  ;;  %s1149_s2 = int_to_ptr.hbm [resolvable:$true] %s1148_s2 }
  0x72   : > { %v603_v57 = vadd.f32 %v599_v10, %v593_v42  ;;  %v398_v40 = vadd.f32 %v394_v50, %v385_v3  ;;  %v420_v59 = vadd.f32 %v416_v33, %v407_v37  ;;  %v438_v8 = vmul.f32 %v1708_v47, %v1453_v17  ;;  %s1150_s8 = scalar_lea.hbm %s1149_s2, 32  ;;  %p1155_p11 = scmp.lt.s32.totalorder %s1149_s2, %s1803_s5 }
  0x73   : > { %v513_v28 = vand.u32 2147483647, %v509_v48  ;;  %v559_v38 = vsub.f32 %v1646_v49, %v555_v53  ;;  %v658_v63 = vadd.f32 %v654_v23, %v648_v58  ;;  %v451_v31 = vmul.f32 %v898_v46, %v1427_v7  ;;  %p1151_p1 = scmp.ne.s32.totalorder %s1149_s2, %s1150_s8  ;;  %p1156_p12 = scmp.lt.s32.totalorder %s1154_s28, %s1150_s8 }
  0x74   : > { %v610_v30 = vadd.f32 %v1589_v24, %v603_v57  ;;  %v442_v52 = vadd.f32 %v438_v8, %v429_v34  ;;  %v460_v0 = vmul.f32 %v1721_v29, %v1453_v17  ;;  %v470_v12 = vmul.f32 %v1455_v18, %v398_v40 }
  0x75   : > { %v476_v10 = vmul.f32 %v1472_v25, %v420_v59  ;;  %v563_v2 = vand.u32 2147483647, %v559_v38  ;;  %v665_v6 = vadd.f32 %v1613_v62, %v658_v63  ;;  %v520_v49 = vmul.f32 %v1523_v44, %v398_v40  ;;  %p1152_p4 = pnand %p1151_p1, %p1346_p3  ;;  %p1157_p13 = por %p1156_p12, %p1155_p11 }
  0x76   : > { %v614_v32 = vsub.f32 %v1655_v55, %v610_v30  ;;  %v464_v14 = vadd.f32 %v460_v0, %v451_v31  ;;  %v486_v22 = vmul.f32 %v1474_v26, %v442_v52  ;;  %v526_v7 = vmul.f32 %v1526_v45, %v420_v59 }
  0x77   : > { %v480_v19 = vadd.f32 %v476_v10, %v470_v12  ;;  %v567_v9 = vadd.f32 %v563_v2, %v513_v28  ;;  %v669_v17 = vsub.f32 %v1664_v1, %v665_v6  ;;  %v536_v18 = vmul.f32 %v1538_v51, %v442_v52  ;;  %p1153_p8 = pneg %p1152_p4 }
  0x78   : > { %v618_v15 = vand.u32 2147483647, %v614_v32  ;;  %v496_v23 = vmul.f32 %v1499_v35, %v464_v14  ;;  %v530_v55 = vadd.f32 %v526_v7, %v520_v49  ;;  %v546_v3 = vmul.f32 %v1548_v54, %v464_v14 }
  0x79   : > { %v490_v25 = vadd.f32 %v486_v22, %v480_v19  ;;  %v673_v44 = vand.u32 2147483647, %v669_v17  ;;  %v574_v16 = vmul.f32 %v1561_v61, %v398_v40  ;;  %v580_v26 = vmul.f32 %v1573_v5, %v420_v59  ;;  %p1158_p0 = pnand %p1157_p13, %p1153_p8 }
  0x7a   : > { %v622_v41 = vadd.f32 %v618_v15, %v567_v9  ;;  %v540_v45 = vadd.f32 %v536_v18, %v530_v55  ;;  %v590_v13 = vmul.f32 %v1578_v11, %v442_v52  ;;  %v600_v1 = vmul.f32 %v1584_v21, %v464_v14 }
  0x7b   : > { %v500_v42 = vadd.f32 %v496_v23, %v490_v25  ;;  %v584_v48 = vadd.f32 %v580_v26, %v574_v16  ;;  %v629_v35 = vmul.f32 %v1595_v39, %v398_v40  ;;  %v635_v50 = vmul.f32 %v1600_v43, %v420_v59 }
  0x7c   : > { %v677_v51 = vadd.f32 %v673_v44, %v622_v41  ;;  %v550_v37 = vadd.f32 %v546_v3, %v540_v45  ;;  %v645_v61 = vmul.f32 %v1605_v4, %v442_v52  ;;  %v655_v46 = vmul.f32 %v1609_v56, %v464_v14 }
  0x7d   : > { %v506_v54 = vadd.f32 %v1502_v36, %v500_v42  ;;  %v594_v5 = vadd.f32 %v590_v13, %v584_v48  ;;  %v639_v33 = vadd.f32 %v635_v50, %v629_v35 }
  0x7e   : > { %v556_v21 = vadd.f32 %v1558_v60, %v550_v37  ;;  %689 = vst [vmem:[%s1680_s24 + $0x10] sm:$0xff] %v677_v51 }
  0x7f   : > { %v510_v11 = vsub.f32 %v1696_v20, %v506_v54  ;;  %v604_v53 = vadd.f32 %v600_v1, %v594_v5  ;;  %v649_v39 = vadd.f32 %v645_v61, %v639_v33 }
  0x80   : > { %v560_v43 = vsub.f32 %v1700_v27, %v556_v21 }
  0x81   : > { %v514_v57 = vand.u32 2147483647, %v510_v11  ;;  %v611_v36 = vadd.f32 %v1589_v24, %v604_v53  ;;  %v659_v58 = vadd.f32 %v655_v46, %v649_v39 }
  0x82   : > { %v564_v4 = vand.u32 2147483647, %v560_v43 }
  0x83   : > { %v615_v56 = vsub.f32 %v1708_v47, %v611_v36  ;;  %v666_v20 = vadd.f32 %v1613_v62, %v659_v58 }
  0x84   : > { %v568_v34 = vadd.f32 %v564_v4, %v514_v57 }
  0x85   : > { %v619_v60 = vand.u32 2147483647, %v615_v56  ;;  %v670_v27 = vsub.f32 %v1721_v29, %v666_v20 }
  0x87   : > { %v623_v28 = vadd.f32 %v619_v60, %v568_v34  ;;  %v674_v24 = vand.u32 2147483647, %v670_v27 }
  0x89   : > { %v678_v40 = vadd.f32 %v674_v24, %v623_v28 }
  0x8b   : > { %690 = vst [vmem:[%s1680_s24 + $0x18] sm:$0xff] %v678_v40 }
  0x8c   : > { %1161 = shalt.err (!%p1158_p0)
}
  0x8d   : > { %s1235_s0 = smov 128   ;;  %s1236_s14 = smov 8  }
  0x8e   : > { %942 = dma.vmem_to_hbm [thread:$0]  (%p1346_p3), %s707_s15, 512, %s709_s1, %s692_s21, %s1235_s0, %s1235_s0, %s1236_s14  }
  0x8f PF: > { %s723_s16 = sand.u32 1, %s1208_s18   ;;  %p962_p5 = pnand %p864_p9, %p1316_p6 }
  0x90   : > { %s724_s25 = scalar_lea.sflag [#allocation4], %s723_s16 }
  0x91   : > { %p963_p7 = pneg %p962_p5 }
  0x93   : > { %1203 = dma.done.wait (%p963_p7), %s724_s25, 512  }
  0x94   : > { %1205 = vsyncadd (%p963_p7), %s724_s25, 4294966784  ;;  %s26_s23 = sadd.s32 1, %s1228_s23   ;;  %s1821_s21 = sld [smem:[#allocation18_spill]] }
  0x95   : > { %p23_p10 = scmp.ge.s32.totalorder %s26_s23, 4   ;;  %s1822_s22 = sld [smem:[#allocation19_spill]] }
  0x96   : > { %s1823_s18 = smov %s1212_s19  ;;  %s1824_s19 = smov %s1216_s20 }
  0x97   : > { %s1825_s20 = smov %s1365_s11  ;;  %25 = sbr.rel (!%p23_p10) target bundleno = 14 (0xe), region = 121 }
  0x9c   :  { %730 = vsyncpa [#allocation3], 1 }
  0x9d   :  { %732 = vsyncpa [#allocation3 + $0x1], 1 }
  0x9e   :  { %733 = vsyncpa [#allocation11], 1 }
  0x9f   :  { %735 = vsyncpa [#allocation11 + $0x1], 1 }
  0xa0   :  { %736 = vsyncpa [#allocation4], 1 }
  0xa1   :  { %738 = vsyncpa [#allocation4 + $0x1], 1 }
  0xa2   :  { %739 = vsyncpa [#allocation5], 1 }
  0xa3   :  { %741 = vsyncpa [#allocation5 + $0x1], 1 }
  0xa4   :  { %742 = vsyncpa [#allocation7], 1 }

</bundles_post_ra>
